<compile_context>
chip_gen: v6e
topology: v6e:2x2x1
jax: 0.10.0
libtpu: 0.0.40
codegen_flags: <defaults>
</compile_context>

<pallas_src>
import functools

import jax
import jax.numpy as jnp
from jax.experimental import pallas as pl
from jax.experimental.pallas import tpu as pltpu


def _rmsnorm_kernel(x_ref, w_ref, o_ref, *, eps, inv_dim, sub_rows, n_sub):
    # x_ref/o_ref: (TILE_ROWS, PAD_DIM) native dtype; w_ref: (1, PAD_DIM) f32.
    w = w_ref[...]  # loaded once per grid step, reused by every sub-chunk

    def body(s, carry):
        r = pl.multiple_of(s * sub_rows, sub_rows)
        x = x_ref[pl.ds(r, sub_rows), :].astype(jnp.float32)
        ss = jnp.sum(x * x, axis=-1, keepdims=True)
        rms = jax.lax.rsqrt(ss * inv_dim + eps)            # EUP rsqrt slot
        o_ref[pl.ds(r, sub_rows), :] = ((x * rms) * w).astype(o_ref.dtype)
        return carry

    # n_sub is a small compile-time constant; full unroll keeps the live f32
    # state at one sub-chunk while the DMA block stays large.
    jax.lax.fori_loop(0, n_sub, body, 0, unroll=True)


def _vmem_budget():
    """Return (data_budget_bytes, vmem_limit_bytes) for this chip generation."""
    try:
        cap = int(pltpu.get_tpu_info().vmem_capacity_bytes)
    except Exception:  # interpret mode / unknown chip -> assume small VMEM
        cap = 64 * 1024 * 1024
    if cap >= 100 * 1024 * 1024:                 # v5e / v6e: 128 MiB physical
        return 44 * 1024 * 1024, 96 * 1024 * 1024
    return 20 * 1024 * 1024, 40 * 1024 * 1024    # v7x: 64 MiB per TensorCore


def _choose_tiling(rows, pad_dim, itemsize, *, max_tile_rows=2048,
                   sub_work_bytes=4 * 1024 * 1024):
    data_budget, vmem_limit = _vmem_budget()
    # Only the double-buffered input + output blocks live at native dtype;
    # the f32 working copy is bounded per sub-chunk (below), not per tile.
    per_row = 4 * itemsize * pad_dim
    tile_rows = max(8, min(max_tile_rows, data_budget // per_row))
    tile_rows = (tile_rows // 8) * 8
    needed = ((rows + 7) // 8) * 8       # never tile wider than the array needs
    tile_rows = max(8, min(tile_rows, needed))
    # Row sub-chunk: keep the f32 upcast + intermediate under ~sub_work_bytes.
    sub_rows = max(8, min(tile_rows, sub_work_bytes // (8 * pad_dim)))
    sub_rows = (sub_rows // 8) * 8
    tile_rows = max(sub_rows, (tile_rows // sub_rows) * sub_rows)
    return tile_rows, sub_rows, vmem_limit


def rmsnorm(x, weight, eps=1e-6, *, tile_rows=None):
    """RMSNorm over the last axis. x: (..., dim), weight: (dim,)."""
    orig_shape = x.shape
    dim = orig_shape[-1]
    rows = 1
    for s in orig_shape[:-1]:
        rows *= s

    x2d = x.reshape(rows, dim)                         # native dtype in HBM
    w2d = weight.reshape(1, dim).astype(jnp.float32)   # tiny one-time cast

    # Lane-dense stores: pad the feature axis to a multiple of 128. Zero
    # padding leaves sum(x^2) unchanged; padded output columns are sliced off.
    pad_dim = ((dim + 127) // 128) * 128
    if pad_dim != dim:
        x2d = jnp.pad(x2d, ((0, 0), (0, pad_dim - dim)))
        w2d = jnp.pad(w2d, ((0, 0), (0, pad_dim - dim)))

    itemsize = x2d.dtype.itemsize
    auto_rows, sub_rows, vmem_limit = _choose_tiling(rows, pad_dim, itemsize)
    if tile_rows is None:
        tile_rows = auto_rows
    else:
        tile_rows = max(sub_rows, (tile_rows // sub_rows) * sub_rows)
    n_sub = tile_rows // sub_rows

    grid = (pl.cdiv(rows, tile_rows),)   # ragged last tile handled by Pallas

    kernel = functools.partial(
        _rmsnorm_kernel, eps=float(eps), inv_dim=1.0 / float(dim),
        sub_rows=sub_rows, n_sub=n_sub)

    cost = pl.CostEstimate(
        flops=3 * rows * pad_dim,                   # square + 2 muls / element
        transcendentals=rows,                       # one rsqrt per row
        bytes_accessed=2 * rows * pad_dim * itemsize + 4 * pad_dim)

    out = pl.pallas_call(
        kernel,
        out_shape=jax.ShapeDtypeStruct((rows, pad_dim), x2d.dtype),
        grid_spec=pltpu.PrefetchScalarGridSpec(
            num_scalar_prefetch=0,
            grid=grid,
            in_specs=[
                pl.BlockSpec((tile_rows, pad_dim), lambda i: (i, 0)),
                pl.BlockSpec((1, pad_dim), lambda i: (0, 0)),  # weight resident
            ],
            out_specs=pl.BlockSpec((tile_rows, pad_dim), lambda i: (i, 0)),
        ),
        compiler_params=pltpu.CompilerParams(
            # Rows are independent -> shard row tiles across TensorCores.
            # TODO(synk): on v7x, confirm in the Mosaic dump that this axis is
            # split across both TCs; if not, switch to pltpu.CORE_PARALLEL.
            dimension_semantics=("parallel",),
            vmem_limit_bytes=vmem_limit,
        ),
        cost_estimate=cost,
    )(x2d, w2d)

    if pad_dim != dim:
        out = out[:, :dim]
    return out.reshape(orig_shape)


def rmsnorm_ref(x, weight, eps=1e-6):
    x32 = x.astype(jnp.float32)
    rms = jax.lax.rsqrt(jnp.mean(x32 * x32, axis=-1, keepdims=True) + eps)
    return (x32 * rms * weight.astype(jnp.float32)).astype(x.dtype)


if __name__ == "__main__":
    key = jax.random.PRNGKey(0)
    batch, seq, hidden = 2, 8, 32
    x = jax.random.normal(key, (batch, seq, hidden), dtype=jnp.float32)
    # nn.Parameter(torch.ones(dim)) -> deterministic ones
    weight = jnp.ones((hidden,), dtype=jnp.float32)

    out = rmsnorm(x, weight, eps=1e-6)
    jax.block_until_ready(out)

    ref = rmsnorm_ref(x, weight, eps=1e-6)
    assert out.shape == x.shape
    assert out.dtype == x.dtype
    assert jnp.allclose(out, ref, atol=1e-5, rtol=1e-5), "mismatch vs reference"

    print("KERNEL_OK")
</pallas_src>

<mosaic_0001>
module attributes {stable_mosaic.version = 11 : i64} {
  func.func @_rmsnorm_kernel(%arg0: i32, %arg1: memref<16x128xf32, #tpu.memory_space<vmem>>, %arg2: memref<1x128xf32, #tpu.memory_space<vmem>>, %arg3: memref<16x128xf32, #tpu.memory_space<vmem>>) attributes {dimension_semantics = [#tpu.dimension_semantics<parallel>], iteration_bounds = array<i64: 1>, scalar_prefetch = 0 : i64, scratch_operands = 0 : i64, tpu.core_type = #tpu.core_type<tc>, window_params = [{transform_indices = @transform_0, window_bounds = array<i64: 16, 128>}, {pipeline_mode = #tpu.pipeline_mode<synchronous>, transform_indices = @transform_1, window_bounds = array<i64: 1, 128>}, {transform_indices = @transform_2, window_bounds = array<i64: 16, 128>}]} {
    %c0 = arith.constant 0 : index
    %c0_0 = arith.constant 0 : index
    %0 = vector.load %arg2[%c0, %c0_0] : memref<1x128xf32, #tpu.memory_space<vmem>>, vector<1x128xf32>
    %c0_i32 = arith.constant 0 : i32
    %c16_i32 = arith.constant 16 : i32
    %1 = arith.muli %c0_i32, %c16_i32 : i32
    %2 = tpu.assume_multiple %1, 16 : i32
    %3 = arith.index_cast %2 : i32 to index
    %c0_1 = arith.constant 0 : index
    %4 = vector.load %arg1[%3, %c0_1] : memref<16x128xf32, #tpu.memory_space<vmem>>, vector<16x128xf32>
    %5 = arith.mulf %4, %4 : vector<16x128xf32>
    %cst = arith.constant dense<0.000000e+00> : vector<16xf32>
    %6 = vector.multi_reduction <add>, %5, %cst [1] : vector<16x128xf32> to vector<16xf32>
    %7 = vector.shape_cast %6 : vector<16xf32> to vector<16x1xf32>
    %cst_2 = arith.constant 3.125000e-02 : f32
    %8 = vector.broadcast %cst_2 : f32 to vector<16x1xf32>
    %9 = arith.mulf %7, %8 : vector<16x1xf32>
    %cst_3 = arith.constant 9.99999997E-7 : f32
    %10 = vector.broadcast %cst_3 : f32 to vector<16x1xf32>
    %11 = arith.addf %9, %10 : vector<16x1xf32>
    %12 = math.rsqrt %11 : vector<16x1xf32>
    %13 = vector.broadcast %12 : vector<16x1xf32> to vector<16x128xf32>
    %14 = arith.mulf %4, %13 : vector<16x128xf32>
    %15 = vector.broadcast %0 : vector<1x128xf32> to vector<16x128xf32>
    %16 = arith.mulf %14, %15 : vector<16x128xf32>
    %17 = arith.index_cast %2 : i32 to index
    %c0_4 = arith.constant 0 : index
    %18 = vector.load %arg3[%17, %c0_4] : memref<16x128xf32, #tpu.memory_space<vmem>>, vector<16x128xf32>
    tpu.vector_store %arg3[%17, %c0_4], %16 {strides = array<i32>} : memref<16x128xf32, #tpu.memory_space<vmem>>, vector<16x128xf32>,
    %c1_i32 = arith.constant 1 : i32
    return
  }
  func.func @transform_0(%arg0: i32) -> (i32, i32) {
    %c0_i32 = arith.constant 0 : i32
    %c0_i32_0 = arith.constant 0 : i32
    return %arg0, %c0_i32 : i32, i32
  }
  func.func @transform_1(%arg0: i32) -> (i32, i32) {
    %c0_i32 = arith.constant 0 : i32
    %c0_i32_0 = arith.constant 0 : i32
    %c0_i32_1 = arith.constant 0 : i32
    return %c0_i32, %c0_i32_0 : i32, i32
  }
  func.func @transform_2(%arg0: i32) -> (i32, i32) {
    %c0_i32 = arith.constant 0 : i32
    %c0_i32_0 = arith.constant 0 : i32
    return %arg0, %c0_i32 : i32, i32
  }
}

</mosaic_0001>

<bundles_post_ra>
// kernel: tpu_custom_call.1
= control target key start
LH: loop header
LB: loop body
LE: loop exit
PB: predicated region body
PF: predicated region fallthrough
CT: control target
= control target key end

     0   :  { %7 = vsyncpa [#allocation3], 0  ;;  %s157_s0 = inlined_call_operand.hbm [shape: f32[16,128], index: 0, kind: input, shape index: {}]   ;;  %s158_s1 = inlined_call_operand.vmem [shape: f32[1,128], index: 1, kind: input, shape index: {}]   ;;  %s159_s2 = inlined_call_operand.hbm [shape: f32[16,128], index: 2, kind: output, shape index: {}]  }
   0x1   :  { %8 = vsyncpa [#allocation4], 0  ;;  %s123_s9 = smov [#allocation2]  }
   0x2   :  { %s14_s10 = sshll.u32 %s123_s9, 4  ;;  %s15_s10 = int_to_ptr.vmem [resolvable:$true] %s14_s10 }
   0x3   :  { %s87_s11 = scalar_lea.vmem %s15_s10, 256  ;;  %p92_p1 = scmp.lt.s32.totalorder %s15_s10, %s15_s10 }
   0x4   :  { %p88_p0 = scmp.ne.s32.totalorder %s15_s10, %s87_s11  ;;  %p93_p2 = scmp.lt.s32.totalorder %s87_s11, %s87_s11 }
   0x6   :  { %p94_p3 = por %p93_p2, %p92_p1 }
   0x8   :  { %p95_p4 = pnand %p94_p3, %p88_p0 }
   0xa   :  { %98 = shalt.err (!%p95_p4)
}
   0xb   :  { %s124_s12 = smov 128   ;;  %s125_s13 = smov 8  }
   0xc   :  { %20 = dma.hbm_to_vmem [thread:$0]  %s157_s0, 256, %s15_s10, [#allocation3], %s124_s12, %s124_s12, %s125_s13  }
   0xd   :  { %119 = dma.done.wait [#allocation3], 256  }
   0xe   :  { %120 = vsyncadd [#allocation3], 4294967040  ;;  %v27_v0 = vld [vmem:[#allocation2] sm:$0xff]  ;;  %v28_v1 = vld [vmem:[#allocation2 + $0x8] sm:$0xff]  ;;  %s126_s0 = smov [#allocation5]  }
   0xf   :  { %v29_v2 = vmul.f32 %v27_v0, %v27_v0  ;;  %v30_v3 = vmul.f32 %v28_v1, %v28_v1  ;;  %v70_v11 = vld [vmem:[%s158_s1] ss:$0 sm:$0xff]  ;;  %s58_s18 = sshll.u32 %s126_s0, 4  ;;  %s59_s18 = int_to_ptr.vmem [resolvable:$true] %s58_s18 }
  0x10   :  { %s99_s19 = scalar_lea.vmem %s59_s18, 256  ;;  %p104_p6 = scmp.lt.s32.totalorder %s59_s18, %s59_s18 }
  0x11   :  { %31 = vadd.xlane.f32.xlu0 %v29_v2  ;;  %p100_p5 = scmp.ne.s32.totalorder %s59_s18, %s99_s19  ;;  %p105_p7 = scmp.lt.s32.totalorder %s99_s19, %s99_s19 }
  0x13   :  { %p106_p8 = por %p105_p7, %p104_p6 }
  0x15   :  { %33 = vadd.xlane.f32.xlu0 %v30_v3  ;;  %p107_p9 = pnand %p106_p8, %p100_p5 }
  0x9a   :  { %v32_v4 = vpop.xlane.xlu0 %31 }
  0x9b   :  { %v35_v5 = vmul.f32 0.03125, %v32_v4 }
  0x9d   :  { %v37_v6 = vadd.f32 1e-06, %v35_v5 }
  0x9e   :  { %v34_v7 = vpop.xlane.xlu0 %33 }
  0x9f   :  { %75 = vrsqrt.f32 %v37_v6  ;;  %v36_v8 = vmul.f32 0.03125, %v34_v7 }
  0xa1   :  { %v38_v9 = vadd.f32 1e-06, %v36_v8 }
  0xa3   :  { %77 = vrsqrt.f32 %v38_v9 }
  0xac   :  { %v76_v10 = vpop.eup %75 }
  0xad   :  { %v41_v12 = vmul.f32 %v76_v10, %v27_v0 }
  0xaf   :  { %v49_v13 = vmul.f32 %v70_v11, %v41_v12 }
  0xb0   :  { %v78_v14 = vpop.eup %77 }
  0xb1   :  { %v42_v15 = vmul.f32 %v78_v14, %v28_v1  ;;  %51 = vst [vmem:[#allocation5] sm:$0xff] %v49_v13 }
  0xb3   :  { %v50_v16 = vmul.f32 %v70_v11, %v42_v15 }
  0xb5   :  { %52 = vst [vmem:[#allocation5 + $0x8] sm:$0xff] %v50_v16 }
  0xb6   :  { %110 = shalt.err (!%p107_p9)
}
  0xb7   :  { %64 = dma.vmem_to_hbm [thread:$0]  %s59_s18, 256, %s159_s2, [#allocation4], %s124_s12, %s124_s12, %s125_s13  }
  0xb8   :  { %121 = dma.done.wait [#allocation4], 256  }
  0xb9   :  { %122 = vsyncadd [#allocation4], 4294967040 }
  0xba   :  { %68 = vsyncpa [#allocation3], 1 }
  0xbb   :  { %69 = vsyncpa [#allocation4], 1 }

</bundles_post_ra>
